<compile_context>
chip_gen: v6e
topology: v6e:2x2x1
jax: 0.10.0
libtpu: 0.0.40
codegen_flags: <defaults>
</compile_context>

<pallas_src>
import functools

import jax
import jax.numpy as jnp
from jax import lax
from jax.experimental import pallas as pl
from jax.experimental.pallas import tpu as pltpu

_HIGHEST = lax.Precision.HIGHEST
_VMEM = pl.BlockSpec(memory_space=pltpu.MemorySpace.VMEM)


def _round_up(n, m):
    return ((n + m - 1) // m) * m


def _packed_layout(cin, hh, out_f):
    """Sublane-aligned row offsets of each section in the packed param buffer."""
    w1_cols = 3 * hh              # [features | s1 (head-replicated) | s2 (head-replicated)]
    w2_cols = out_f + 2           # [features | s1 | s2]
    r_w1 = 0
    r_b1 = _round_up(cin, 8)
    r_w2 = r_b1 + 8
    r_b2 = r_w2 + _round_up(hh, 8)
    rows = r_b2 + 8
    width = max(w1_cols, w2_cols)
    return r_w1, r_b1, r_w2, r_b2, rows, width


def _leaky_relu(v):
    return jnp.where(v > 0, v, 0.01 * v)


def _gal_attend(feat, s1_0, s1_1, s2, n0, n1):
    """Edge attention + softmax-normalized scatter-add, collapsed over the
    binarized edge patterns (all source/target indices are 0 or 1).

    feat : (N, F) projected node features (only rows 0/1 are message sources)
    s1_0 : (1, S) attention score <a1, feat> of source node 0
    s1_1 : (1, S) attention score <a1, feat> of source node 1
    s2   : (N, S) attention score <a2, feat> of every target node
    n0   : (N, 1) #edges (src=0 -> target row); 0 for rows >= 2
    n1   : (N, 1) #edges (src=1 -> target row); 0 for rows >= 2
    S is F (per-head-replicated scores, layer 1) or 1 (output layer).
    """
    e0 = _leaky_relu(s1_0 + s2)                       # (N, S)  e_{0 -> row}
    e1 = _leaky_relu(s1_1 + s2)                       # (N, S)  e_{1 -> row}
    e_all = n0 * e0 + n1 * e1                         # (N, S)  scatter-add over targets
    c0 = n0 * jnp.exp(e0 - e_all)                     # summed normalized coeffs
    c1 = n1 * jnp.exp(e1 - e_all)
    return c0 * feat[0:1, :] + c1 * feat[1:2, :]      # (N, F); rows >= 2 exactly 0


def _make_gat_kernel(n_nodes, n_edges, cin, hid_f, n_heads, out_f):
    hh = n_heads * hid_f
    r_w1, r_b1, r_w2, r_b2, _, _ = _packed_layout(cin, hh, out_f)
    w1_cols = 3 * hh
    w2_cols = out_f + 2

    def kernel(e_ref, x_ref, p_ref, o_ref):
        # ---- edge-pattern counts (binarization done in-kernel, like the module)
        ei = e_ref[...]                                     # (2, E) int32
        src1 = jnp.where(ei[0:1, :] > 0, 1.0, 0.0)          # (1, E) src node == 1
        dst = jnp.where(ei[1:2, :] > 0, 1, 0)               # (1, E) dst in {0, 1}
        row_ids = lax.broadcasted_iota(jnp.int32, (n_nodes, n_edges), 0)
        dmask = jnp.where(row_ids == dst, 1.0, 0.0)         # (N, E) edge targets row
        n1 = jnp.sum(dmask * src1, axis=1, keepdims=True)   # (N, 1) #edges 1 -> row
        n0 = jnp.sum(dmask, axis=1, keepdims=True) - n1     # (N, 1) #edges 0 -> row
        # rows >= 2 have n0 = n1 = 0, so every aggregated row >= 2 is exactly 0.

        # ---- layer 1: all heads in one MXU matmul [x W | s1 | s2] -----------
        w1 = p_ref[r_w1:r_w1 + cin, 0:w1_cols]
        b1 = p_ref[r_b1:r_b1 + 1, 0:w1_cols]
        z1 = jnp.dot(x_ref[...], w1, precision=_HIGHEST,
                     preferred_element_type=jnp.float32) + b1        # (N, 3*hh)
        h = _gal_attend(z1[:, 0:hh],                  # multi-head features
                        z1[0:1, hh:2 * hh],           # s1 of node 0 (head-replicated)
                        z1[1:2, hh:2 * hh],           # s1 of node 1
                        z1[:, 2 * hh:3 * hh],         # s2 of every node
                        n0, n1)                       # (N, hh)

        # ---- layer 2 (output GAL): one matmul [h W | s1 | s2] ---------------
        w2 = p_ref[r_w2:r_w2 + hh, 0:w2_cols]
        b2 = p_ref[r_b2:r_b2 + 1, 0:w2_cols]
        z2 = jnp.dot(h, w2, precision=_HIGHEST,
                     preferred_element_type=jnp.float32) + b2        # (N, out_f+2)
        o = _gal_attend(z2[:, 0:out_f],
                        z2[0:1, out_f:out_f + 1],
                        z2[1:2, out_f:out_f + 1],
                        z2[:, out_f + 1:out_f + 2],
                        n0, n1)                       # (N, out_f); rows >= 2 are 0

        # ---- ELU + log_softmax (zero rows land on -log(out_f) naturally) ----
        y = jnp.where(o > 0, o, jnp.exp(o) - 1.0)
        m = jnp.max(y, axis=1, keepdims=True)
        ls = y - (m + jnp.log(jnp.sum(jnp.exp(y - m), axis=1, keepdims=True)))
        o_ref[...] = ls                               # single unmasked full store

    return kernel


def prepare_gat_params(params, hid_f, out_f):
    """One-time prep: fold a1/a2 into the weights (head-replicated columns for
    layer 1) and pack everything into ONE sublane-aligned f32 VMEM buffer."""
    hp = _HIGHEST
    heads = params["heads"]
    cin = heads[0]["w"].shape[1]
    hh = len(heads) * hid_f

    feat_w, s1_w, s2_w = [], [], []
    feat_b, s1_b, s2_b = [], [], []
    for p in heads:
        wt = p["w"].T                         # (cin, hid)
        b = p["b"]                            # (hid,)
        a1 = p["a"][:hid_f, 0]
        a2 = p["a"][hid_f:, 0]
        feat_w.append(wt)
        feat_b.append(b)
        s1_w.append(jnp.tile(jnp.dot(wt, a1, precision=hp)[:, None], (1, hid_f)))
        s2_w.append(jnp.tile(jnp.dot(wt, a2, precision=hp)[:, None], (1, hid_f)))
        s1_b.append(jnp.full((hid_f,), jnp.dot(b, a1, precision=hp)))
        s2_b.append(jnp.full((hid_f,), jnp.dot(b, a2, precision=hp)))
    w1 = jnp.concatenate(feat_w + s1_w + s2_w, axis=1)      # (cin, 3*hh)
    b1 = jnp.concatenate(feat_b + s1_b + s2_b)              # (3*hh,)

    po = params["out"]
    wot = po["w"].T                           # (hh, out_f)
    bo = po["b"]
    a1o = po["a"][:out_f, 0]
    a2o = po["a"][out_f:, 0]
    w2 = jnp.concatenate([wot,
                          jnp.dot(wot, a1o, precision=hp)[:, None],
                          jnp.dot(wot, a2o, precision=hp)[:, None]], axis=1)
    b2 = jnp.concatenate([bo,
                          jnp.dot(bo, a1o, precision=hp)[None],
                          jnp.dot(bo, a2o, precision=hp)[None]])

    r_w1, r_b1, r_w2, r_b2, rows, width = _packed_layout(cin, hh, out_f)
    packed = jnp.zeros((rows, width), jnp.float32)
    packed = packed.at[r_w1:r_w1 + cin, 0:3 * hh].set(w1.astype(jnp.float32))
    packed = packed.at[r_b1, 0:3 * hh].set(b1.astype(jnp.float32))
    packed = packed.at[r_w2:r_w2 + hh, 0:out_f + 2].set(w2.astype(jnp.float32))
    packed = packed.at[r_b2, 0:out_f + 2].set(b2.astype(jnp.float32))
    return packed


@functools.partial(jax.jit, static_argnames=("hid_f", "out_f", "n_heads"))
def gat_pallas(x, edge_index, packed, *, hid_f, out_f, n_heads):
    n_nodes, cin = x.shape
    n_edges = edge_index.shape[1]
    if n_nodes < 2:
        raise ValueError("GAT kernel assumes >= 2 nodes (binarized edge indices "
                         "address nodes 0 and 1).")
    hh = n_heads * hid_f
    _, _, _, _, rows, width = _packed_layout(cin, hh, out_f)
    assert packed.shape == (rows, width), (packed.shape, (rows, width))

    kernel = _make_gat_kernel(n_nodes, n_edges, cin, hid_f, n_heads, out_f)
    return pl.pallas_call(
        kernel,
        out_shape=jax.ShapeDtypeStruct((n_nodes, out_f), jnp.float32),
        in_specs=[_VMEM, _VMEM, _VMEM],
        out_specs=_VMEM,
    )(edge_index, x, packed)


# ----------------------- pure-JAX reference (for checking) -----------------
def _gal_ref(x, edge_index, w, b, a):
    x = jnp.dot(x, w.T, precision=_HIGHEST) + b
    ei = jnp.where(edge_index > 0, 1, 0)
    row, col = ei[0], ei[1]
    a_in = jnp.concatenate([x[row], x[col]], axis=1)
    temp = jnp.dot(a_in, a, precision=_HIGHEST)[:, 0]
    e = jnp.where(temp > 0, temp, 0.01 * temp)
    e_all = jnp.zeros((x.shape[0],), jnp.float32).at[col].add(e)
    e = jnp.exp(e) / jnp.exp(e_all[col])
    return jnp.zeros_like(x).at[col].add(e[:, None] * x[row])


def _gat_ref(x, edge_index, params):
    h = jnp.concatenate([_gal_ref(x, edge_index, p["w"], p["b"], p["a"])
                         for p in params["heads"]], axis=1)
    po = params["out"]
    o = _gal_ref(h, edge_index, po["w"], po["b"], po["a"])
    o = jnp.where(o > 0, o, jnp.exp(o) - 1.0)
    return jax.nn.log_softmax(o, axis=1)


# ---------------------------------------------------------------------------
if __name__ == "__main__":
    N, E = 16, 32
    in_f, hid_f, out_f, n_heads = 8, 16, 8, 2

    key = jax.random.PRNGKey(0)
    k_x, k_e, *k_p = jax.random.split(key, 2 + 3 * (n_heads + 1))

    x = jax.random.normal(k_x, (N, in_f), jnp.float32)
    edge_index = jax.random.randint(k_e, (2, E), 0, N, jnp.int32)

    def make_gal_params(ks, cin, cout):
        kw, kb, ka = ks
        return {
            "w": 0.2 * jax.random.normal(kw, (cout, cin), jnp.float32),
            "b": 0.1 * jax.random.normal(kb, (cout,), jnp.float32),
            "a": 0.1 * jax.random.normal(ka, (2 * cout, 1), jnp.float32),
        }

    params = {
        "heads": [make_gal_params(k_p[3 * i:3 * i + 3], in_f, hid_f)
                  for i in range(n_heads)],
        "out": make_gal_params(k_p[3 * n_heads:3 * n_heads + 3],
                               hid_f * n_heads, out_f),
    }

    packed = prepare_gat_params(params, hid_f, out_f)

    out = gat_pallas(x, edge_index, packed,
                     hid_f=hid_f, out_f=out_f, n_heads=n_heads)
    out = jax.block_until_ready(out)

    ref = _gat_ref(x, edge_index, params)
    assert out.shape == (N, out_f)
    assert bool(jnp.all(jnp.isfinite(out)))
    max_err = float(jnp.max(jnp.abs(out - ref)))
    if max_err > 2e-3:
        raise AssertionError(f"mismatch vs reference, max abs err = {max_err}")
    print("KERNEL_OK")
</pallas_src>

<mosaic_0001>
module attributes {stable_mosaic.version = 11 : i64} {
  func.func @kernel(%arg0: memref<2x32xi32, #tpu.memory_space<vmem>>, %arg1: memref<16x8xf32, #tpu.memory_space<vmem>>, %arg2: memref<56x96xf32, #tpu.memory_space<vmem>>, %arg3: memref<16x8xf32, #tpu.memory_space<vmem>>) attributes {dimension_semantics = [], scalar_prefetch = 0 : i64, scratch_operands = 0 : i64, tpu.core_type = #tpu.core_type<tc>} {
    %c0 = arith.constant 0 : index
    %c0_0 = arith.constant 0 : index
    %0 = vector.load %arg0[%c0, %c0_0] : memref<2x32xi32, #tpu.memory_space<vmem>>, vector<2x32xi32>
    %1 = vector.extract_strided_slice %0 {offsets = [0, 0], sizes = [1, 32], strides = [1, 1]} : vector<2x32xi32> to vector<1x32xi32>
    %c0_i32 = arith.constant 0 : i32
    %2 = vector.broadcast %c0_i32 : i32 to vector<1x32xi32>
    %3 = arith.cmpi sgt, %1, %2 : vector<1x32xi32>
    %cst = arith.constant 1.000000e+00 : f32
    %cst_1 = arith.constant 0.000000e+00 : f32
    %4 = vector.broadcast %cst : f32 to vector<1x32xf32>
    %5 = vector.broadcast %cst_1 : f32 to vector<1x32xf32>
    %6 = arith.select %3, %4, %5 : vector<1x32xi1>, vector<1x32xf32>
    %7 = vector.extract_strided_slice %0 {offsets = [1, 0], sizes = [1, 32], strides = [1, 1]} : vector<2x32xi32> to vector<1x32xi32>
    %c0_i32_2 = arith.constant 0 : i32
    %8 = vector.broadcast %c0_i32_2 : i32 to vector<1x32xi32>
    %9 = arith.cmpi sgt, %7, %8 : vector<1x32xi32>
    %c1_i32 = arith.constant 1 : i32
    %c0_i32_3 = arith.constant 0 : i32
    %10 = vector.broadcast %c1_i32 : i32 to vector<1x32xi32>
    %11 = vector.broadcast %c0_i32_3 : i32 to vector<1x32xi32>
    %12 = arith.select %9, %10, %11 : vector<1x32xi1>, vector<1x32xi32>
    %13 = tpu.iota {dimensions = array<i32: 0>} : vector<16x32xi32>
    %14 = vector.broadcast %12 : vector<1x32xi32> to vector<16x32xi32>
    %15 = arith.cmpi eq, %13, %14 : vector<16x32xi32>
    %cst_4 = arith.constant 1.000000e+00 : f32
    %cst_5 = arith.constant 0.000000e+00 : f32
    %16 = vector.broadcast %cst_4 : f32 to vector<16x32xf32>
    %17 = vector.broadcast %cst_5 : f32 to vector<16x32xf32>
    %18 = arith.select %15, %16, %17 : vector<16x32xi1>, vector<16x32xf32>
    %19 = vector.broadcast %6 : vector<1x32xf32> to vector<16x32xf32>
    %20 = arith.mulf %18, %19 : vector<16x32xf32>
    %cst_6 = arith.constant dense<0.000000e+00> : vector<16xf32>
    %21 = vector.multi_reduction <add>, %20, %cst_6 [1] : vector<16x32xf32> to vector<16xf32>
    %22 = vector.shape_cast %21 : vector<16xf32> to vector<16x1xf32>
    %cst_7 = arith.constant dense<0.000000e+00> : vector<16xf32>
    %23 = vector.multi_reduction <add>, %18, %cst_7 [1] : vector<16x32xf32> to vector<16xf32>
    %24 = vector.shape_cast %23 : vector<16xf32> to vector<16x1xf32>
    %25 = arith.subf %24, %22 : vector<16x1xf32>
    %c0_8 = arith.constant 0 : index
    %c0_9 = arith.constant 0 : index
    %26 = vector.load %arg2[%c0_8, %c0_9] : memref<56x96xf32, #tpu.memory_space<vmem>>, vector<8x96xf32>
    %c8 = arith.constant 8 : index
    %c0_10 = arith.constant 0 : index
    %27 = vector.load %arg2[%c8, %c0_10] : memref<56x96xf32, #tpu.memory_space<vmem>>, vector<1x96xf32>
    %c0_11 = arith.constant 0 : index
    %c0_12 = arith.constant 0 : index
    %28 = vector.load %arg1[%c0_11, %c0_12] : memref<16x8xf32, #tpu.memory_space<vmem>>, vector<16x8xf32>
    %cst_13 = arith.constant dense<0.000000e+00> : vector<16x96xf32>
    %29 = tpu.matmul %28, %26, %cst_13 {dimension_numbers = #tpu.dot_dimension_numbers<[1], [0], [0], [1], [0, 0, 1, 1], [], []>, precision = #tpu.contract_precision<fp32>} : vector<16x8xf32>, vector<8x96xf32>, vector<16x96xf32> -> vector<16x96xf32>
    %30 = vector.broadcast %27 : vector<1x96xf32> to vector<16x96xf32>
    %31 = arith.addf %29, %30 : vector<16x96xf32>
    %32 = vector.extract_strided_slice %31 {offsets = [0, 0], sizes = [16, 32], strides = [1, 1]} : vector<16x96xf32> to vector<16x32xf32>
    %33 = vector.extract_strided_slice %31 {offsets = [0, 32], sizes = [1, 32], strides = [1, 1]} : vector<16x96xf32> to vector<1x32xf32>
    %34 = vector.extract_strided_slice %31 {offsets = [1, 32], sizes = [1, 32], strides = [1, 1]} : vector<16x96xf32> to vector<1x32xf32>
    %35 = vector.extract_strided_slice %31 {offsets = [0, 64], sizes = [16, 32], strides = [1, 1]} : vector<16x96xf32> to vector<16x32xf32>
    %36 = vector.broadcast %33 : vector<1x32xf32> to vector<16x32xf32>
    %37 = arith.addf %36, %35 : vector<16x32xf32>
    %cst_14 = arith.constant 0.000000e+00 : f32
    %38 = vector.broadcast %cst_14 : f32 to vector<16x32xf32>
    %39 = arith.cmpf ogt, %37, %38 : vector<16x32xf32>
    %cst_15 = arith.constant 0.00999999977 : f32
    %40 = vector.broadcast %cst_15 : f32 to vector<16x32xf32>
    %41 = arith.mulf %40, %37 : vector<16x32xf32>
    %42 = arith.select %39, %37, %41 : vector<16x32xi1>, vector<16x32xf32>
    %43 = vector.broadcast %34 : vector<1x32xf32> to vector<16x32xf32>
    %44 = arith.addf %43, %35 : vector<16x32xf32>
    %cst_16 = arith.constant 0.000000e+00 : f32
    %45 = vector.broadcast %cst_16 : f32 to vector<16x32xf32>
    %46 = arith.cmpf ogt, %44, %45 : vector<16x32xf32>
    %cst_17 = arith.constant 0.00999999977 : f32
    %47 = vector.broadcast %cst_17 : f32 to vector<16x32xf32>
    %48 = arith.mulf %47, %44 : vector<16x32xf32>
    %49 = arith.select %46, %44, %48 : vector<16x32xi1>, vector<16x32xf32>
    %50 = vector.broadcast %25 : vector<16x1xf32> to vector<16x32xf32>
    %51 = arith.mulf %50, %42 : vector<16x32xf32>
    %52 = vector.broadcast %22 : vector<16x1xf32> to vector<16x32xf32>
    %53 = arith.mulf %52, %49 : vector<16x32xf32>
    %54 = arith.addf %51, %53 : vector<16x32xf32>
    %55 = arith.subf %42, %54 : vector<16x32xf32>
    %56 = math.exp %55 : vector<16x32xf32>
    %57 = vector.broadcast %25 : vector<16x1xf32> to vector<16x32xf32>
    %58 = arith.mulf %57, %56 : vector<16x32xf32>
    %59 = arith.subf %49, %54 : vector<16x32xf32>
    %60 = math.exp %59 : vector<16x32xf32>
    %61 = vector.broadcast %22 : vector<16x1xf32> to vector<16x32xf32>
    %62 = arith.mulf %61, %60 : vector<16x32xf32>
    %63 = vector.extract_strided_slice %32 {offsets = [0, 0], sizes = [1, 32], strides = [1, 1]} : vector<16x32xf32> to vector<1x32xf32>
    %64 = vector.broadcast %63 : vector<1x32xf32> to vector<16x32xf32>
    %65 = arith.mulf %58, %64 : vector<16x32xf32>
    %66 = vector.extract_strided_slice %32 {offsets = [1, 0], sizes = [1, 32], strides = [1, 1]} : vector<16x32xf32> to vector<1x32xf32>
    %67 = vector.broadcast %66 : vector<1x32xf32> to vector<16x32xf32>
    %68 = arith.mulf %62, %67 : vector<16x32xf32>
    %69 = arith.addf %65, %68 : vector<16x32xf32>
    %c16 = arith.constant 16 : index
    %c0_18 = arith.constant 0 : index
    %70 = vector.load %arg2[%c16, %c0_18] : memref<56x96xf32, #tpu.memory_space<vmem>>, vector<32x10xf32>
    %c48 = arith.constant 48 : index
    %c0_19 = arith.constant 0 : index
    %71 = vector.load %arg2[%c48, %c0_19] : memref<56x96xf32, #tpu.memory_space<vmem>>, vector<1x10xf32>
    %cst_20 = arith.constant dense<0.000000e+00> : vector<16x10xf32>
    %72 = tpu.matmul %69, %70, %cst_20 {dimension_numbers = #tpu.dot_dimension_numbers<[1], [0], [0], [1], [0, 0, 1, 1], [], []>, precision = #tpu.contract_precision<fp32>} : vector<16x32xf32>, vector<32x10xf32>, vector<16x10xf32> -> vector<16x10xf32>
    %73 = vector.broadcast %71 : vector<1x10xf32> to vector<16x10xf32>
    %74 = arith.addf %72, %73 : vector<16x10xf32>
    %75 = vector.extract_strided_slice %74 {offsets = [0, 0], sizes = [16, 8], strides = [1, 1]} : vector<16x10xf32> to vector<16x8xf32>
    %76 = vector.extract_strided_slice %74 {offsets = [0, 8], sizes = [1, 1], strides = [1, 1]} : vector<16x10xf32> to vector<1x1xf32>
    %77 = vector.extract_strided_slice %74 {offsets = [1, 8], sizes = [1, 1], strides = [1, 1]} : vector<16x10xf32> to vector<1x1xf32>
    %78 = vector.extract_strided_slice %74 {offsets = [0, 9], sizes = [16, 1], strides = [1, 1]} : vector<16x10xf32> to vector<16x1xf32>
    %79 = vector.broadcast %76 : vector<1x1xf32> to vector<16x1xf32>
    %80 = arith.addf %79, %78 : vector<16x1xf32>
    %cst_21 = arith.constant 0.000000e+00 : f32
    %81 = vector.broadcast %cst_21 : f32 to vector<16x1xf32>
    %82 = arith.cmpf ogt, %80, %81 : vector<16x1xf32>
    %cst_22 = arith.constant 0.00999999977 : f32
    %83 = vector.broadcast %cst_22 : f32 to vector<16x1xf32>
    %84 = arith.mulf %83, %80 : vector<16x1xf32>
    %85 = arith.select %82, %80, %84 : vector<16x1xi1>, vector<16x1xf32>
    %86 = vector.broadcast %77 : vector<1x1xf32> to vector<16x1xf32>
    %87 = arith.addf %86, %78 : vector<16x1xf32>
    %cst_23 = arith.constant 0.000000e+00 : f32
    %88 = vector.broadcast %cst_23 : f32 to vector<16x1xf32>
    %89 = arith.cmpf ogt, %87, %88 : vector<16x1xf32>
    %cst_24 = arith.constant 0.00999999977 : f32
    %90 = vector.broadcast %cst_24 : f32 to vector<16x1xf32>
    %91 = arith.mulf %90, %87 : vector<16x1xf32>
    %92 = arith.select %89, %87, %91 : vector<16x1xi1>, vector<16x1xf32>
    %93 = arith.mulf %25, %85 : vector<16x1xf32>
    %94 = arith.mulf %22, %92 : vector<16x1xf32>
    %95 = arith.addf %93, %94 : vector<16x1xf32>
    %96 = arith.subf %85, %95 : vector<16x1xf32>
    %97 = math.exp %96 : vector<16x1xf32>
    %98 = arith.mulf %25, %97 : vector<16x1xf32>
    %99 = arith.subf %92, %95 : vector<16x1xf32>
    %100 = math.exp %99 : vector<16x1xf32>
    %101 = arith.mulf %22, %100 : vector<16x1xf32>
    %102 = vector.extract_strided_slice %75 {offsets = [0, 0], sizes = [1, 8], strides = [1, 1]} : vector<16x8xf32> to vector<1x8xf32>
    %103 = vector.broadcast %98 : vector<16x1xf32> to vector<16x8xf32>
    %104 = vector.broadcast %102 : vector<1x8xf32> to vector<16x8xf32>
    %105 = arith.mulf %103, %104 : vector<16x8xf32>
    %106 = vector.extract_strided_slice %75 {offsets = [1, 0], sizes = [1, 8], strides = [1, 1]} : vector<16x8xf32> to vector<1x8xf32>
    %107 = vector.broadcast %101 : vector<16x1xf32> to vector<16x8xf32>
    %108 = vector.broadcast %106 : vector<1x8xf32> to vector<16x8xf32>
    %109 = arith.mulf %107, %108 : vector<16x8xf32>
    %110 = arith.addf %105, %109 : vector<16x8xf32>
    %cst_25 = arith.constant 0.000000e+00 : f32
    %111 = vector.broadcast %cst_25 : f32 to vector<16x8xf32>
    %112 = arith.cmpf ogt, %110, %111 : vector<16x8xf32>
    %113 = math.exp %110 : vector<16x8xf32>
    %cst_26 = arith.constant 1.000000e+00 : f32
    %114 = vector.broadcast %cst_26 : f32 to vector<16x8xf32>
    %115 = arith.subf %113, %114 : vector<16x8xf32>
    %116 = arith.select %112, %110, %115 : vector<16x8xi1>, vector<16x8xf32>
    %cst_27 = arith.constant dense<0xFF800000> : vector<16xf32>
    %117 = vector.multi_reduction <maximumf>, %116, %cst_27 [1] : vector<16x8xf32> to vector<16xf32>
    %118 = vector.shape_cast %117 : vector<16xf32> to vector<16x1xf32>
    %119 = vector.broadcast %118 : vector<16x1xf32> to vector<16x8xf32>
    %120 = arith.subf %116, %119 : vector<16x8xf32>
    %121 = math.exp %120 : vector<16x8xf32>
    %cst_28 = arith.constant dense<0.000000e+00> : vector<16xf32>
    %122 = vector.multi_reduction <add>, %121, %cst_28 [1] : vector<16x8xf32> to vector<16xf32>
    %123 = vector.shape_cast %122 : vector<16xf32> to vector<16x1xf32>
    %124 = math.log %123 : vector<16x1xf32>
    %125 = arith.addf %118, %124 : vector<16x1xf32>
    %126 = vector.broadcast %125 : vector<16x1xf32> to vector<16x8xf32>
    %127 = arith.subf %116, %126 : vector<16x8xf32>
    %c0_29 = arith.constant 0 : index
    %c0_30 = arith.constant 0 : index
    %128 = vector.load %arg3[%c0_29, %c0_30] : memref<16x8xf32, #tpu.memory_space<vmem>>, vector<16x8xf32>
    tpu.vector_store %arg3[%c0_29, %c0_30], %127 {strides = array<i32>} : memref<16x8xf32, #tpu.memory_space<vmem>>, vector<16x8xf32>,
    return
  }
}

</mosaic_0001>

<bundles_post_ra>
// kernel: gat_pallas.1
= control target key start
LH: loop header
LB: loop body
LE: loop exit
PB: predicated region body
PF: predicated region fallthrough
CT: control target
= control target key end

     0   :  { %8 = vsyncpa [#allocation3], 0  ;;  %s1521_s12 = smov [#allocation2]   ;;  %s1704_s0 = inlined_call_operand.vmem [shape: s32[2,32], index: 0, kind: input, shape index: {}]   ;;  %s1705_s1 = inlined_call_operand.vmem [shape: f32[16,8], index: 1, kind: input, shape index: {}]   ;;  %s1706_s2 = inlined_call_operand.hbm [shape: f32[56,96], index: 2, kind: input, shape index: {}]   ;;  %s1707_s3 = inlined_call_operand.vmem [shape: f32[16,8], index: 3, kind: output, shape index: {}]  }
   0x1   :  { %s18_s13 = sshll.u32 %s1521_s12, 4  ;;  %s19_s13 = int_to_ptr.vmem [resolvable:$true] %s18_s13 }
   0x2   :  { %s1507_s14 = scalar_lea.vmem %s19_s13, 896  ;;  %p1512_p1 = scmp.lt.s32.totalorder %s19_s13, %s19_s13 }
   0x3   :  { %p1508_p0 = scmp.ne.s32.totalorder %s19_s13, %s1507_s14  ;;  %p1513_p2 = scmp.lt.s32.totalorder %s1507_s14, %s1507_s14 }
   0x5   :  { %p1514_p3 = por %p1513_p2, %p1512_p1 }
   0x7   :  { %p1515_p4 = pnand %p1514_p3, %p1508_p0 }
   0x9   :  { %1518 = shalt.err (!%p1515_p4)
}
   0xa   :  { %s1522_s15 = smov 128   ;;  %s1523_s16 = smov 8  }
   0xb   :  { %24 = dma.hbm_to_vmem [thread:$0]  %s1706_s2, 896, %s19_s13, [#allocation3], %s1522_s15, %s1522_s15, %s1523_s16  }
   0xc   :  { %1519 = dma.done.wait [#allocation3], 896  }
   0xd   :  { %1520 = vsyncadd [#allocation3], 4294966400  ;;  %v32_v0 = vlaneseq  ;;  %vm72_vm0 = vcmask 64512   ;;  %v64_v2 = vld [vmem:[#allocation2] sm:$0xff]  ;;  %v67_v4 = vld [vmem:[%s1705_s1 + $0x8] sm:$0xff]  ;;  %v1524_v14 = vmov 0  }
   0xe   :  { %v66_v3 = vld [vmem:[%s1705_s1] sm:$0xff]  ;;  %v110_v6 = vand.u32 4294901760, %v64_v2  ;;  %v77_v8 = vsel %vm72_vm0, %v67_v4, 0  ;;  %vm49_vm2 = vcmask 261120   ;;  %v1525_v21 = vmov 0.0   ;;  %s1527_s1 = smov 32  }
   0xf   :  { %v33_v1 = vshrl.u32 %v32_v0, 7  ;;  %v74_v7 = vsel %vm72_vm0, %v66_v3, 0  ;;  %v28_v9 = vld [vmem:[%s1704_s0] sm:$0x3]  ;;  %v155_v11 = vand.u32 4294901760, %v77_v8  ;;  %s1526_s0 = smov 96  }
  0x10   :  { %v145_v10 = vand.u32 4294901760, %v74_v7  ;;  %vm29_vm1 = vcmp.gt.s32.totalorder %v28_v9, 0  ;;  %1364 = vmatprep.subr.mxu0 %v110_v6  ;;  %v197_v13 = vsub.f32 %v64_v2, %v110_v6  ;;  %v1306_v40 = vld [vmem:[#allocation2 + $0x8] ss:$0 sm:$0xff]  ;;  %v638_v4 = vld [vmem:[#allocation2 + $0x20] sm:$0xff]  ;;  %s1528_s24 = smov 127  }
  0x11   :  { %v1559_v5 = vsub.s32 1, %v33_v1  ;;  %v34_v12 = vadd.s32 8, %v33_v1  ;;  %v31_v15 = vsel %vm29_vm1, 1, %v1524_v14  ;;  %1365 = vmatpush3.msra.mxu0 %v110_v6  ;;  %v156_v17 = vsub.f32 %v77_v8, %v155_v11  ;;  %v639_v3 = vld [vmem:[#allocation2 + $0x28] sm:$0xff] }
  0x12   :  { %v146_v16 = vsub.f32 %v74_v7, %v145_v10  ;;  %1371 = vmatprep.mubr.f32.mxu1 %v145_v10  ;;  %v198_v19 = vand.u32 4294901760, %v197_v13  ;;  %1374 = vmatprep.subr.mxu0 %v197_v13  ;;  %v1568_v20 = vsub.s32 0, %v33_v1  ;;  %v30_v22 = vsel %vm29_vm1, 1.0, %v1525_v21 }
  0x13   :  { %v38_v18 = vrot.slane %v31_v15, %v1559_v5  ;;  %v157_v24 = vand.u32 4294901760, %v156_v17  ;;  %v1582_v7 = vand.u32 4294901760, %v638_v4 }
  0x14   :  { %v147_v23 = vand.u32 4294901760, %v146_v16  ;;  %v199_v25 = vsub.f32 %v197_v13, %v198_v19  ;;  %v46_v32 = vrot.slane %v30_v22, %v1568_v20 }
  0x15   :  { %vm39_vm3 = vcmp.eq.s32.totalorder %v33_v1, %v38_v18  ;;  %vm40_vm4 = vcmp.eq.s32.totalorder %v34_v12, %v38_v18  ;;  %v158_v29 = vsub.f32 %v156_v17, %v157_v24  ;;  %v1588_v9 = vsub.f32 %v638_v4, %v1582_v7 }
  0x16   :  { %v41_v26 = vsel %vm39_vm3, 1.0, %v1525_v21  ;;  %v42_v27 = vsel %vm40_vm4, 1.0, %v1525_v21  ;;  %v148_v28 = vsub.f32 %v146_v16, %v147_v23  ;;  %v200_v31 = vand.u32 4294901760, %v199_v25 }
  0x17   :  { %v56_v30 = vsel %vm49_vm2, %v41_v26, 0.0  ;;  %v59_v33 = vsel %vm49_vm2, %v42_v27, 0.0  ;;  %v159_v35 = vand.u32 4294901760, %v158_v29  ;;  %v47_v36 = vmul.f32 %v46_v32, %v41_v26 }
  0x18   :  { %57 = vadd.xlane.f32.xlu0 %v56_v30  ;;  %v149_v34 = vand.u32 4294901760, %v148_v28  ;;  %60 = vadd.xlane.f32.xlu1 %v59_v33  ;;  %v48_v37 = vmul.f32 %v46_v32, %v42_v27 }
  0x19   :  { %1369 = vmatprep.subr.mxu1 %v200_v31  ;;  %v50_v38 = vsel %vm49_vm2, %v47_v36, 0.0 }
  0x1a   :  { %1366 = vmatprep.mubr.f32.mxu0 %v149_v34  ;;  %1370 = vmatpush3.msra.mxu1 %v200_v31  ;;  %v53_v39 = vsel %vm49_vm2, %v48_v37, 0.0 }
  0x1b   :  { %1367 = vmatmul.mubr.f32.vlgmr.msra.gmra.mxu0 %v159_v35  ;;  %1372 = vmatmul.mubr.f32.vlgmr.msra.gmra.mxu1 %v155_v11 }
  0x1c   :  { %1375 = vmatpush3.msra.mxu0 %v197_v13  ;;  %1379 = vmatprep.subr.mxu1 %v110_v6 }
  0x1d   :  { %1380 = vmatpush3.msra.mxu1 %v110_v6  ;;  %1376 = vmatprep.mubr.f32.mxu0 %v146_v16 }
  0x1e   :  { %1381 = vmatprep.mubr.f32.mxu1 %v147_v23  ;;  %1384 = vmatprep.subr.mxu0 %v198_v19 }
  0x1f   :  { %1377 = vmatmul.mubr.f32.vlgmr.msra.gmra.mxu0 %v156_v17  ;;  %1382 = vmatmul.mubr.f32.vlgmr.msra.gmra.mxu1 %v157_v24 }
  0x20   :  { %1385 = vmatpush3.msra.mxu0 %v198_v19  ;;  %1389 = vmatprep.subr.mxu1 %v110_v6 }
  0x21   :  { %1390 = vmatpush3.msra.mxu1 %v110_v6  ;;  %1386 = vmatprep.mubr.f32.mxu0 %v145_v10  ;;  %v1580_v6 = vand.u32 4294901760, %v639_v3 }
  0x22   :  { %1391 = vmatprep.mubr.f32.mxu1 %v145_v10  ;;  %51 = vadd.xlane.f32.xlu0 %v50_v38 }
  0x23   :  { %1387 = vmatmul.mubr.f32.vlgmr.msra.gmra.mxu0 %v155_v11  ;;  %1392 = vmatmul.mubr.f32.vlgmr.msra.gmra.mxu1 %v155_v11  ;;  %v1585_v8 = vsub.f32 %v639_v3, %v1580_v6  ;;  %v1596_v11 = vand.u32 4294901760, %v1588_v9 }
  0x24   :  { %54 = vadd.xlane.f32.xlu1 %v53_v39  ;;  %1394 = vmatprep.subr.mxu0 %v1580_v6 }
  0x25   :  { %1395 = vmatpush3.msra.mxu0 %v1580_v6  ;;  %v1593_v10 = vand.u32 4294901760, %v1585_v8  ;;  %v779_v13 = vsub.f32 %v1588_v9, %v1596_v11 }
  0x26   :  { %1396 = vmatprep.subr.mxu0 %v1582_v7 }
  0x27   :  { %1397 = vmatpush3.msra.mxu0 %v1582_v7  ;;  %v772_v12 = vsub.f32 %v1585_v8, %v1593_v10  ;;  %v780_v15 = vand.u32 4294901760, %v779_v13 }
  0x29   :  { %v773_v14 = vand.u32 4294901760, %v772_v12 }
  0x2b   :  { %1405 = vmatprep.subr.mxu1 %v773_v14 }
  0x2c   :  { %1406 = vmatpush3.msra.mxu1 %v773_v14 }
  0x2d   :  { %1407 = vmatprep.subr.mxu1 %v780_v15 }
  0x2e   :  { %1408 = vmatpush3.msra.mxu1 %v780_v15 }
  0xa1   :  { %v61_v16 = vpop.xlane.xlu1 %60  ;;  %v58_v17 = vpop.xlane.xlu0 %57 }
  0xab   :  { %v1606_v19 = vpop.xlane.xlu0 %51 }
  0xac   :  { %v1614_v35 = vsub.f32 %v58_v17, %v1606_v19 }
  0xad   :  { %v1604_v18 = vpop.xlane.xlu1 %54 }
  0xae   :  { %v1609_v27 = vsub.f32 %v61_v16, %v1604_v18 }
  0xdb   :  { %v1368_v41 = vpop.f32.mrf.mxu0  ;;  %v1373_v42 = vpop.f32.mrf.mxu1 }
  0xdc   :  { %v162_v43 = vadd.f32 %v1368_v41, %v1306_v40 }
  0xdd   :  { %v151_v44 = vpop.f32.mrf.mxu0  ;;  %v237_v45 = vpop.f32.mrf.mxu1 }
  0xde   :  { %v244_v46 = vadd.f32 %v1373_v42, %v162_v43  ;;  %v152_v47 = vadd.f32 %v1306_v40, %v151_v44 }
  0xdf   :  { %v1378_v48 = vpop.f32.mrf.mxu0  ;;  %v1383_v49 = vpop.f32.mrf.mxu1 }
  0xe0   :  { %v238_v50 = vadd.f32 %v237_v45, %v152_v47  ;;  %v325_v51 = vadd.f32 %v1378_v48, %v244_v46 }
  0xe1   :  { %v317_v52 = vpop.f32.mrf.mxu0  ;;  %v398_v53 = vpop.f32.mrf.mxu1 }
  0xe2   :  { %v407_v54 = vadd.f32 %v1383_v49, %v325_v51  ;;  %v318_v55 = vadd.f32 %v317_v52, %v238_v50  ;;  %v637_v49 = vld [vmem:[#allocation2 + $0x18] sm:$0xff] }
  0xe3   :  { %v1388_v56 = vpop.f32.mrf.mxu0  ;;  %v1393_v57 = vpop.f32.mrf.mxu1  ;;  %v1618_v50 = vand.u32 4294901760, %v637_v49 }
  0xe4   :  { %v399_v58 = vadd.f32 %v398_v53, %v318_v55  ;;  %v487_v59 = vadd.f32 %v1388_v56, %v407_v54  ;;  %v636_v53 = vld [vmem:[#allocation2 + $0x10] sm:$0xff] }
  0xe5   :  { %v480_v60 = vpop.f32.mrf.mxu0  ;;  %v558_v63 = vpop.f32.mrf.mxu1  ;;  %v1621_v54 = vsub.f32 %v637_v49, %v1618_v50  ;;  %v1623_v55 = vand.u32 4294901760, %v636_v53  ;;  %1398 = vmatprep.subr.mxu0 %v1618_v50 }
  0xe6   :  { %v565_v61 = vadd.f32 %v1393_v57, %v487_v59  ;;  %v481_v62 = vadd.f32 %v480_v60, %v399_v58  ;;  %1399 = vmatpush3.msra.mxu0 %v1618_v50 }
  0xe7   :  { %v1628_v56 = vand.u32 4294901760, %v1621_v54  ;;  %v1631_v57 = vsub.f32 %v636_v53, %v1623_v55  ;;  %1400 = vmatprep.subr.mxu0 %v1623_v55 }
  0xe8   :  { %v559_v0 = vadd.f32 %v558_v63, %v481_v62  ;;  %576 = vrot.lane.b32.xlu1 %v565_v61, %s1526_s0  ;;  %1401 = vmatpush3.msra.mxu0 %v1623_v55 }
  0xe9   :  { %v786_v58 = vsub.f32 %v1621_v54, %v1628_v56  ;;  %v1638_v59 = vand.u32 4294901760, %v1631_v57  ;;  %1416 = vmatprep.subr.mxu0 %v1585_v8 }
  0xea   :  { %574 = vrot.lane.b32.xlu0 %v559_v0, %s1526_s0  ;;  %v571_v1 = vrot.slane %v559_v0, %v1568_v20  ;;  %v591_v2 = vrot.slane %v559_v0, %v1559_v5 }
  0xeb   :  { %v787_v60 = vand.u32 4294901760, %v786_v58  ;;  %v793_v61 = vsub.f32 %v1631_v57, %v1638_v59 }
  0xec   :  { %623 = vrot.lane.b32.xlu1 %v571_v1, %s1527_s1 }
  0xed   :  { %1409 = vmatprep.subr.mxu1 %v787_v60  ;;  %v794_v63 = vand.u32 4294901760, %v793_v61 }
  0xee   :  { %1410 = vmatpush3.msra.mxu1 %v787_v60  ;;  %v1529_v60 = vmov 8  }
  0xef   :  { %1411 = vmatprep.subr.mxu1 %v794_v63  ;;  %1469 = vset.pattern.permute.xlu1 %v1529_v60 }
  0xf0   :  { %629 = vrot.lane.b32.xlu1 %v591_v2, %s1527_s1  ;;  %1412 = vmatpush3.msra.mxu1 %v794_v63 }
  0xf1   :  { %1427 = vmatprep.subr.mxu1 %v1580_v6  ;;  %1470 = vset.pattern.permute.xlu0 %v1529_v60 }
 0x15a   :  { %v577_v21 = vpop.permute.xlu1 %576 }
 0x15b   :  { %v581_v22 = vadd.f32 %v577_v21, %v571_v1  ;;  %v593_v23 = vadd.f32 %v591_v2, %v577_v21 }
 0x15c   :  { %v575_v24 = vpop.permute.xlu0 %574 }
 0x15d   :  { %vm583_vm5 = vcmp.gt.f32.partialorder %v581_v22, 0.0  ;;  %v585_v25 = vmul.f32 0.01, %v581_v22  ;;  %vm595_vm6 = vcmp.gt.f32.partialorder %v593_v23, 0.0  ;;  %v597_v26 = vmul.f32 0.01, %v593_v23 }
 0x15e   :  { %v580_v28 = vadd.f32 %v575_v24, %v571_v1  ;;  %v592_v29 = vadd.f32 %v591_v2, %v575_v24  ;;  %v624_v62 = vpop.permute.xlu1 %623 }
 0x15f   :  { %v587_v30 = vsel %vm583_vm5, %v581_v22, %v585_v25  ;;  %v599_v31 = vsel %vm595_vm6, %v593_v23, %v597_v26 }
 0x160   :  { %v601_v32 = vmul.f32 %v587_v30, %v1609_v27  ;;  %v603_v33 = vmul.f32 %v599_v31, %v1604_v18  ;;  %vm582_vm7 = vcmp.gt.f32.partialorder %v580_v28, 0.0  ;;  %v584_v34 = vmul.f32 0.01, %v580_v28 }
 0x161   :  { %vm594_vm8 = vcmp.gt.f32.partialorder %v592_v29, 0.0  ;;  %v596_v36 = vmul.f32 0.01, %v592_v29 }
 0x162   :  { %v605_v37 = vadd.f32 %v603_v33, %v601_v32  ;;  %v586_v38 = vsel %vm582_vm7, %v580_v28, %v584_v34  ;;  %v630_v12 = vpop.permute.xlu1 %629 }
 0x163   :  { %v598_v39 = vsel %vm594_vm8, %v592_v29, %v596_v36  ;;  %v600_v40 = vmul.f32 %v586_v38, %v1614_v35 }
 0x164   :  { %v607_v41 = vsub.f32 %v587_v30, %v605_v37  ;;  %v615_v42 = vsub.f32 %v599_v31, %v605_v37  ;;  %v602_v43 = vmul.f32 %v598_v39, %v1606_v19 }
 0x166   :  { %v610_v44 = vmul.f32 1.442695, %v607_v41  ;;  %v618_v45 = vmul.f32 1.442695, %v615_v42  ;;  %v604_v46 = vadd.f32 %v602_v43, %v600_v40 }
 0x168   :  { %1471 = vpow2.f32 %v610_v44  ;;  %v606_v47 = vsub.f32 %v586_v38, %v604_v46  ;;  %v614_v48 = vsub.f32 %v598_v39, %v604_v46 }
 0x169   :  { %1473 = vpow2.f32 %v618_v45 }
 0x16a   :  { %v608_v51 = vmul.f32 1.442695, %v606_v47  ;;  %v616_v52 = vmul.f32 1.442695, %v614_v48 }
 0x16c   :  { %1475 = vpow2.f32 %v608_v51 }
 0x16d   :  { %1477 = vpow2.f32 %v616_v52 }
 0x175   :  { %v1472_v0 = vpop.eup %1471 }
 0x176   :  { %v1474_v1 = vpop.eup %1473  ;;  %v613_v2 = vmul.f32 %v1472_v0, %v1609_v27 }
 0x177   :  { %v621_v3 = vmul.f32 %v1474_v1, %v1604_v18 }
 0x178   :  { %v627_v4 = vmul.f32 %v624_v62, %v613_v2 }
 0x179   :  { %v1476_v13 = vpop.eup %1475  ;;  %v633_v14 = vmul.f32 %v630_v12, %v621_v3 }
 0x17a   :  { %v1478_v15 = vpop.eup %1477  ;;  %v612_v16 = vmul.f32 %v1476_v13, %v1614_v35 }
 0x17b   :  { %v620_v17 = vmul.f32 %v1478_v15, %v1606_v19  ;;  %v635_v21 = vadd.f32 %v633_v14, %v627_v4 }
 0x17c   :  { %v626_v22 = vmul.f32 %v624_v62, %v612_v16 }
 0x17d   :  { %v632_v23 = vmul.f32 %v630_v12, %v620_v17  ;;  %649 = vrot.lane.b32.xlu1 %v635_v21, %s1526_s0 }
 0x17f   :  { %v634_v24 = vadd.f32 %v632_v23, %v626_v22 }
 0x181   :  { %647 = vrot.lane.b32.xlu0 %v634_v24, %s1526_s0 }
 0x1ef   :  { %v650_v25 = vpop.permute.xlu1 %649 }
 0x1f0   :  { %v653_v26 = vsel %vm49_vm2, %v650_v25, 0 }
 0x1f1   :  { %v734_v28 = vand.u32 4294901760, %v653_v26 }
 0x1f3   :  { %v735_v29 = vsub.f32 %v653_v26, %v734_v28  ;;  %v648_v30 = vpop.permute.xlu0 %647 }
 0x1f4   :  { %v651_v31 = vsel %vm49_vm2, %v648_v30, 0 }
 0x1f5   :  { %v724_v32 = vand.u32 4294901760, %v651_v31  ;;  %v736_v33 = vand.u32 4294901760, %v735_v29 }
 0x1f7   :  { %v725_v34 = vsub.f32 %v651_v31, %v724_v32  ;;  %1413 = vmatprep.mubr.f32.mxu1 %v724_v32  ;;  %v737_v37 = vsub.f32 %v735_v29, %v736_v33 }
 0x1f8   :  { %1414 = vmatmul.mubr.f32.vlgmr.msra.gmra.mxu1 %v734_v28 }
 0x1f9   :  { %1428 = vmatpush3.msra.mxu1 %v1580_v6  ;;  %v726_v36 = vand.u32 4294901760, %v725_v34  ;;  %v738_v40 = vand.u32 4294901760, %v737_v37 }
 0x1fa   :  { %1429 = vmatprep.subr.mxu1 %v1582_v7 }
 0x1fb   :  { %1430 = vmatpush3.msra.mxu1 %v1582_v7  ;;  %1435 = vmatprep.mubr.f32.mxu1 %v726_v36  ;;  %v727_v38 = vsub.f32 %v725_v34, %v726_v36 }
 0x1fc   :  { %1431 = vmatprep.subr.mxu1 %v1618_v50 }
 0x1fd   :  { %1432 = vmatpush3.msra.mxu1 %v1618_v50  ;;  %v728_v39 = vand.u32 4294901760, %v727_v38 }
 0x1fe   :  { %1433 = vmatprep.subr.mxu1 %v1623_v55 }
 0x1ff   :  { %1434 = vmatpush3.msra.mxu1 %v1623_v55  ;;  %1402 = vmatprep.mubr.f32.mxu0 %v728_v39 }
 0x200   :  { %1436 = vmatmul.mubr.f32.vlgmr.msra.gmra.mxu1 %v736_v33  ;;  %1449 = vmatprep.subr.mxu1 %v1580_v6 }
 0x201   :  { %1403 = vmatmul.mubr.f32.vlgmr.msra.gmra.mxu0 %v738_v40  ;;  %1450 = vmatpush3.msra.mxu1 %v1580_v6 }
 0x202   :  { %1417 = vmatpush3.msra.mxu0 %v1585_v8  ;;  %1457 = vmatprep.mubr.f32.mxu1 %v724_v32 }
 0x203   :  { %1418 = vmatprep.subr.mxu0 %v1588_v9  ;;  %1424 = vmatprep.mubr.f32.mxu0 %v725_v34 }
 0x204   :  { %1451 = vmatprep.subr.mxu1 %v1582_v7  ;;  %1419 = vmatpush3.msra.mxu0 %v1588_v9 }
 0x205   :  { %1452 = vmatpush3.msra.mxu1 %v1582_v7  ;;  %1420 = vmatprep.subr.mxu0 %v1621_v54  ;;  %v1307_v7 = vld [vmem:[#allocation2 + $0x30] ss:$0 sm:$0xff] }
 0x206   :  { %1453 = vmatprep.subr.mxu1 %v1618_v50  ;;  %1421 = vmatpush3.msra.mxu0 %v1621_v54 }
 0x207   :  { %1454 = vmatpush3.msra.mxu1 %v1618_v50  ;;  %1422 = vmatprep.subr.mxu0 %v1631_v57 }
 0x208   :  { %1455 = vmatprep.subr.mxu1 %v1623_v55  ;;  %1423 = vmatpush3.msra.mxu0 %v1631_v57 }
 0x209   :  { %1456 = vmatpush3.msra.mxu1 %v1623_v55  ;;  %1425 = vmatmul.mubr.f32.vlgmr.msra.gmra.mxu0 %v735_v29 }
 0x20a   :  { %1438 = vmatprep.subr.mxu0 %v1593_v10  ;;  %1458 = vmatmul.mubr.f32.vlgmr.msra.gmra.mxu1 %v734_v28 }
 0x20b   :  { %1439 = vmatpush3.msra.mxu0 %v1593_v10  ;;  %1446 = vmatprep.mubr.f32.mxu0 %v724_v32 }
 0x20c   :  { %1440 = vmatprep.subr.mxu0 %v1596_v11 }
 0x20d   :  { %1441 = vmatpush3.msra.mxu0 %v1596_v11 }
 0x20e   :  { %1442 = vmatprep.subr.mxu0 %v1628_v56 }
 0x20f   :  { %1443 = vmatpush3.msra.mxu0 %v1628_v56 }
 0x210   :  { %1444 = vmatprep.subr.mxu0 %v1638_v59 }
 0x211   :  { %1445 = vmatpush3.msra.mxu0 %v1638_v59 }
 0x212   :  { %1447 = vmatmul.mubr.f32.vlgmr.msra.gmra.mxu0 %v734_v28 }
 0x2b8   :  { %v1415_v8 = vpop.f32.mrf.mxu1 }
 0x2ba   :  { %v831_v43 = vpop.f32.mrf.mxu1 }
 0x2c0   :  { %v1437_v45 = vpop.f32.mrf.mxu1 }
 0x2c1   :  { %v1404_v6 = vpop.f32.mrf.mxu0 }
 0x2c2   :  { %v741_v41 = vadd.f32 %v1404_v6, %v1307_v7  ;;  %v1001_v49 = vpop.f32.mrf.mxu1 }
 0x2c3   :  { %v730_v9 = vpop.f32.mrf.mxu0 }
 0x2c4   :  { %v731_v10 = vadd.f32 %v1307_v7, %v730_v9  ;;  %v838_v44 = vadd.f32 %v1415_v8, %v741_v41 }
 0x2c6   :  { %v832_v47 = vadd.f32 %v831_v43, %v731_v10 }
 0x2c9   :  { %v1426_v42 = vpop.f32.mrf.mxu0 }
 0x2ca   :  { %v925_v46 = vadd.f32 %v1426_v42, %v838_v44  ;;  %v1459_v51 = vpop.f32.mrf.mxu1 }
 0x2cb   :  { %v917_v11 = vpop.f32.mrf.mxu0 }
 0x2cc   :  { %v918_v48 = vadd.f32 %v917_v11, %v832_v47  ;;  %v1010_v50 = vadd.f32 %v1437_v45, %v925_v46  ;;  %v1173_v58 = vpop.f32.mrf.mxu1 }
 0x2ce   :  { %v1002_v54 = vadd.f32 %v1001_v49, %v918_v48 }
 0x2d2   :  { %v1448_v52 = vpop.f32.mrf.mxu0 }
 0x2d3   :  { %v1099_v53 = vadd.f32 %v1448_v52, %v1010_v50 }
 0x2d4   :  { %v1092_v55 = vpop.f32.mrf.mxu0 }
 0x2d5   :  { %v1180_v56 = vadd.f32 %v1459_v51, %v1099_v53  ;;  %v1093_v57 = vadd.f32 %v1092_v55, %v1002_v54 }
 0x2d7   :  { %v1174_v59 = vadd.f32 %v1173_v58, %v1093_v57  ;;  %1191 = vrot.lane.b32.xlu1 %v1180_v56, %s1528_s24 }
 0x2d9   :  { %1189 = vrot.lane.b32.xlu0 %v1174_v59, %s1528_s24  ;;  %v1186_v61 = vrot.slane %v1174_v59, %v1568_v20  ;;  %v1206_v62 = vrot.slane %v1174_v59, %v1559_v5 }
 0x349   :  { %v1192_v63 = vpop.permute.xlu1 %1191 }
 0x34a   :  { %v1196_v0 = vadd.f32 %v1192_v63, %v1186_v61  ;;  %v1208_v1 = vadd.f32 %v1206_v62, %v1192_v63 }
 0x34b   :  { %v1190_v2 = vpop.permute.xlu0 %1189 }
 0x34c   :  { %vm1198_vm9 = vcmp.gt.f32.partialorder %v1196_v0, 0.0  ;;  %v1200_v3 = vmul.f32 0.01, %v1196_v0  ;;  %vm1210_vm10 = vcmp.gt.f32.partialorder %v1208_v1, 0.0  ;;  %v1212_v4 = vmul.f32 0.01, %v1208_v1 }
 0x34d   :  { %v1195_v12 = vadd.f32 %v1190_v2, %v1186_v61  ;;  %v1207_v13 = vadd.f32 %v1206_v62, %v1190_v2 }
 0x34e   :  { %v1202_v14 = vsel %vm1198_vm9, %v1196_v0, %v1200_v3  ;;  %v1214_v15 = vsel %vm1210_vm10, %v1208_v1, %v1212_v4 }
 0x34f   :  { %v1216_v16 = vmul.f32 %v1202_v14, %v1609_v27  ;;  %v1218_v17 = vmul.f32 %v1214_v15, %v1604_v18  ;;  %vm1197_vm11 = vcmp.gt.f32.partialorder %v1195_v12, 0.0  ;;  %v1199_v20 = vmul.f32 0.01, %v1195_v12 }
 0x350   :  { %vm1209_vm12 = vcmp.gt.f32.partialorder %v1207_v13, 0.0  ;;  %v1211_v5 = vmul.f32 0.01, %v1207_v13 }
 0x351   :  { %v1220_v21 = vadd.f32 %v1218_v17, %v1216_v16  ;;  %v1201_v22 = vsel %vm1197_vm11, %v1195_v12, %v1199_v20 }
 0x352   :  { %v1213_v23 = vsel %vm1209_vm12, %v1207_v13, %v1211_v5  ;;  %v1215_v24 = vmul.f32 %v1201_v22, %v1614_v35 }
 0x353   :  { %v1222_v25 = vsub.f32 %v1202_v14, %v1220_v21  ;;  %v1217_v26 = vmul.f32 %v1213_v23, %v1606_v19  ;;  %v1230_v29 = vsub.f32 %v1214_v15, %v1220_v21 }
 0x355   :  { %v1225_v28 = vmul.f32 1.442695, %v1222_v25  ;;  %v1219_v30 = vadd.f32 %v1217_v26, %v1215_v24  ;;  %v1233_v33 = vmul.f32 1.442695, %v1230_v29 }
 0x357   :  { %1479 = vpow2.f32 %v1225_v28  ;;  %v1221_v31 = vsub.f32 %v1201_v22, %v1219_v30  ;;  %v1229_v32 = vsub.f32 %v1213_v23, %v1219_v30 }
 0x359   :  { %v1223_v34 = vmul.f32 1.442695, %v1221_v31  ;;  %v1231_v36 = vmul.f32 1.442695, %v1229_v32 }
 0x35b   :  { %1481 = vpow2.f32 %v1223_v34 }
 0x35c   :  { %1483 = vpow2.f32 %v1231_v36 }
 0x35d   :  { %1485 = vpow2.f32 %v1233_v33 }
 0x364   :  { %v1480_v37 = vpop.eup %1479 }
 0x365   :  { %v1228_v38 = vmul.f32 %v1480_v37, %v1609_v27 }
 0x367   :  { %1244 = vperm.xlu1 %1469, %v1228_v38  }
 0x368   :  { %v1482_v39 = vpop.eup %1481 }
 0x369   :  { %v1484_v40 = vpop.eup %1483  ;;  %v1227_v6 = vmul.f32 %v1482_v39, %v1614_v35 }
 0x36a   :  { %v1486_v7 = vpop.eup %1485  ;;  %v1235_v8 = vmul.f32 %v1484_v40, %v1606_v19 }
 0x36b   :  { %1239 = vperm.xlu0 %1470, %v1227_v6   ;;  %v1236_v9 = vmul.f32 %v1486_v7, %v1604_v18 }
 0x36c   :  { %1251 = vperm.xlu1 %1469, %v1235_v8  }
 0x36f   :  { %1256 = vperm.xlu0 %1470, %v1236_v9  }
 0x3e2   :  { %v1245_v41 = vpop.permute.xlu1 %1244 }
 0x3e3   :  { %v1248_v11 = vmul.f32 %v1245_v41, %v1186_v61 }
 0x3e6   :  { %v1240_v10 = vpop.permute.xlu0 %1239 }
 0x3e7   :  { %v1252_v42 = vpop.permute.xlu1 %1251  ;;  %v1247_v43 = vmul.f32 %v1240_v10, %v1186_v61 }
 0x3e8   :  { %v1259_v44 = vmul.f32 %v1252_v42, %v1206_v62 }
 0x3ea   :  { %v1261_v45 = vadd.f32 %v1259_v44, %v1247_v43  ;;  %v1257_v27 = vpop.permute.xlu0 %1256 }
 0x3eb   :  { %v1260_v46 = vmul.f32 %v1257_v27, %v1206_v62 }
 0x3ec   :  { %v1265_v47 = vmul.f32 1.442695, %v1261_v45  ;;  %vm1263_vm13 = vcmp.gt.f32.partialorder %v1261_v45, 0.0 }
 0x3ed   :  { %v1262_v48 = vadd.f32 %v1260_v46, %v1248_v11 }
 0x3ee   :  { %1487 = vpow2.f32 %v1265_v47 }
 0x3ef   :  { %v1267_v35 = vmul.f32 1.442695, %v1262_v48  ;;  %vm1264_vm14 = vcmp.gt.f32.partialorder %v1262_v48, 0.0 }
 0x3f1   :  { %1489 = vpow2.f32 %v1267_v35 }
 0x3fb   :  { %v1488_v19 = vpop.eup %1487 }
 0x3fc   :  { %v1308_v49 = vadd.f32 -1.0, %v1488_v19 }
 0x3fe   :  { %v1490_v50 = vpop.eup %1489  ;;  %v1271_v18 = vsel %vm1263_vm13, %v1261_v45, %v1308_v49 }
 0x3ff   :  { %v1273_v51 = vsel %vm72_vm0, %v1271_v18, -inf  ;;  %v1309_v52 = vadd.f32 -1.0, %v1490_v50 }
 0x400   :  { %1274 = vmax.xlane.f32.xlu1 %v1273_v51 }
 0x401   :  { %v1272_v53 = vsel %vm1264_vm14, %v1262_v48, %v1309_v52 }
 0x402   :  { %v1276_v54 = vsel %vm72_vm0, %v1272_v53, -inf }
 0x403   :  { %1277 = vmax.xlane.f32.xlu0 %v1276_v54 }
 0x489   :  { %v1275_v55 = vpop.xlane.xlu1 %1274 }
 0x48a   :  { %v1279_v56 = vsub.f32 %v1271_v18, %v1275_v55 }
 0x48c   :  { %v1281_v57 = vmul.f32 1.442695, %v1279_v56  ;;  %v1278_v58 = vpop.xlane.xlu0 %1277 }
 0x48d   :  { %v1280_v59 = vsub.f32 %v1272_v53, %v1278_v58 }
 0x48e   :  { %1491 = vpow2.f32 %v1281_v57 }
 0x48f   :  { %v1283_v60 = vmul.f32 1.442695, %v1280_v59 }
 0x491   :  { %1493 = vpow2.f32 %v1283_v60 }
 0x49b   :  { %v1492_v61 = vpop.eup %1491 }
 0x49c   :  { %v1285_v62 = vsel %vm72_vm0, %v1492_v61, 0.0 }
 0x49d   :  { %1286 = vadd.xlane.f32.xlu0 %v1285_v62 }
 0x49e   :  { %v1494_v63 = vpop.eup %1493 }
 0x49f   :  { %v1288_v0 = vsel %vm72_vm0, %v1494_v63, 0.0 }
 0x4a1   :  { %1289 = vadd.xlane.f32.xlu0 %v1288_v0 }
 0x526   :  { %v1287_v1 = vpop.xlane.xlu0 %1286 }
 0x527   :  { %1495 = vlog2.f32 %v1287_v1 }
 0x52a   :  { %v1290_v2 = vpop.xlane.xlu0 %1289 }
 0x52b   :  { %1497 = vlog2.f32 %v1290_v2 }
 0x534   :  { %v1496_v3 = vpop.eup %1495 }
 0x535   :  { %v1292_v4 = vmul.f32 0.6931472, %v1496_v3 }
 0x537   :  { %v1295_v12 = vadd.f32 %v1292_v4, %v1275_v55 }
 0x538   :  { %v1498_v13 = vpop.eup %1497 }
 0x539   :  { %v1297_v14 = vsub.f32 %v1271_v18, %v1295_v12  ;;  %v1294_v15 = vmul.f32 0.6931472, %v1498_v13 }
 0x53b   :  { %1299 = vst.msk [vmem:[%s1707_s3] sm:$0xff] %vm72_vm0, %v1297_v14  ;;  %v1296_v16 = vadd.f32 %v1294_v15, %v1278_v58 }
 0x53d   :  { %v1298_v17 = vsub.f32 %v1272_v53, %v1296_v16 }
 0x53f   :  { %1300 = vst.msk [vmem:[%s1707_s3 + $0x8] sm:$0xff] %vm72_vm0, %v1298_v17 }
 0x540   :  { %1305 = vsyncpa [#allocation3], 1 }

</bundles_post_ra>
